<compile_context>
chip_gen: v5e
topology: v5e:2x2
jax: 0.10.0
libtpu: 0.0.40
codegen_flags: <defaults>
</compile_context>

<pallas_src>
import jax
import jax.numpy as jnp
from jax import lax
from jax.experimental import pallas as pl
from jax.experimental.pallas import tpu as pltpu


def rnn_fc_kernel(x_ref, h0_ref, wih_t_ref, whh_t_ref, b_ref, wfc_ref, bfc_ref,
                  y_ref, hn_ref):
    # x_ref:  (B, T, I)   h0_ref: (1, B, H)
    # wih_t_ref: (I, H)   whh_t_ref: (H, H)   b_ref: (1, H) = b_ih + b_hh
    # wfc_ref:   (O, H)   bfc_ref:   (1, O)
    # y_ref:  (1, B*T, O) hn_ref: (1, B, H)
    B, T, I = x_ref.shape
    H = h0_ref.shape[-1]
    O = y_ref.shape[-1]

    # ---- hoisted input projection: pre[b, t, :] = x[b, t, :] @ W_ih^T + (b_ih + b_hh)
    x_flat = x_ref[...].reshape(B * T, I).astype(jnp.float32)   # (B*T, I)
    wih_t = wih_t_ref[...]                                      # (I, H)
    b = b_ref[...]                                              # (1, H)
    if I == 1:
        pre_x = x_flat * wih_t + b          # pure VPU broadcast-multiply (I == 1)
    else:
        pre_x = jnp.dot(x_flat, wih_t, preferred_element_type=jnp.float32) + b
    pre_bth = pre_x.reshape(B, T, H)        # row order b*T + t -> (B, T, H)

    # ---- recurrence, fully unrolled (T is small & static); states stay in vregs
    whh_t = whh_t_ref[...]                  # (H, H)
    h = h0_ref[0].astype(jnp.float32)       # (B, H), num_layers == 1
    hs = []
    for t in range(T):
        pre_t = pre_bth[:, t, :]            # static slice, (B, H)
        h = jnp.tanh(pre_t + jnp.dot(h, whh_t, preferred_element_type=jnp.float32))
        hs.append(h)

    hn_ref[...] = h.reshape(1, B, H).astype(hn_ref.dtype)

    # ---- fc head over all hidden states, row order matches x.view(-1, H)
    if B == 1:
        hs_bt = jnp.concatenate(hs, axis=0)                     # (T, H) == (B*T, H)
    else:
        hs_bt = jnp.stack(hs, axis=1).reshape(B * T, H)         # (B, T, H) -> (B*T, H)
    wfc = wfc_ref[...]                                          # (O, H)
    bfc = bfc_ref[...]                                          # (1, O)
    if O == 1:
        # VPU multiply + lane reduce; avoids a 1-column MXU matmul
        y = jnp.sum(hs_bt * wfc, axis=-1, keepdims=True) + bfc  # (B*T, 1)
    else:
        y = lax.dot_general(hs_bt, wfc, (((1,), (1,)), ((), ())),
                            preferred_element_type=jnp.float32) + bfc
    y_ref[...] = y.reshape(1, B * T, O).astype(y_ref.dtype)     # single store


def rnn_net_forward(x, h0, params):
    B, T, I = x.shape
    H = params["w_hh"].shape[0]
    O = params["w_fc"].shape[0]

    wih_t = params["w_ih"].T                              # (I, H)
    whh_t = params["w_hh"].T                              # (H, H)
    b = (params["b_ih"] + params["b_hh"]).reshape(1, H)   # fused RNN biases
    wfc = params["w_fc"]                                  # (O, H)
    bfc = params["b_fc"].reshape(1, O)

    y, hn = pl.pallas_call(
        rnn_fc_kernel,
        out_shape=(jax.ShapeDtypeStruct((1, B * T, O), jnp.float32),
                   jax.ShapeDtypeStruct((1, B, H), jnp.float32)),
        in_specs=[pl.BlockSpec(memory_space=pltpu.MemorySpace.VMEM)] * 7,
        out_specs=(pl.BlockSpec(memory_space=pltpu.MemorySpace.VMEM),
                   pl.BlockSpec(memory_space=pltpu.MemorySpace.VMEM)),
    )(x, h0, wih_t, whh_t, b, wfc, bfc)
    return y, hn


def init_params(key, input_size, hidden_size, output_size):
    # PyTorch default init for nn.RNN / nn.Linear: U(-1/sqrt(H), 1/sqrt(H))
    k = 1.0 / jnp.sqrt(jnp.float32(hidden_size))
    ks = jax.random.split(key, 6)
    u = lambda kk, shape: jax.random.uniform(kk, shape, jnp.float32, -k, k)
    return {
        "w_ih": u(ks[0], (hidden_size, input_size)),
        "w_hh": u(ks[1], (hidden_size, hidden_size)),
        "b_ih": u(ks[2], (hidden_size,)),
        "b_hh": u(ks[3], (hidden_size,)),
        "w_fc": u(ks[4], (output_size, hidden_size)),
        "b_fc": u(ks[5], (output_size,)),
    }


def reference_forward(x, h0, p):
    # pure-JAX reference of the PyTorch module (for correctness check)
    def step(h, x_t):
        h_new = jnp.tanh(x_t @ p["w_ih"].T + p["b_ih"] + h @ p["w_hh"].T + p["b_hh"])
        return h_new, h_new
    h_last, hs = lax.scan(step, h0[0], jnp.swapaxes(x, 0, 1))   # hs: (T, B, H)
    hs_bt = jnp.swapaxes(hs, 0, 1).reshape(-1, p["w_hh"].shape[0])
    y = hs_bt @ p["w_fc"].T + p["b_fc"]
    return y[None, ...], h_last[None, ...]


if __name__ == "__main__":
    input_size, hidden_size, num_layers, output_size = 1, 16, 1, 1
    batch, seq = 1, 8

    key = jax.random.PRNGKey(0)
    k_param, k_x = jax.random.split(key)
    params = init_params(k_param, input_size, hidden_size, output_size)

    x = jax.random.normal(k_x, (batch, seq, input_size), jnp.float32)
    h0 = jnp.zeros((num_layers, batch, hidden_size), jnp.float32)

    y, hn = rnn_net_forward(x, h0, params)
    jax.block_until_ready((y, hn))

    y_ref, hn_ref = reference_forward(x, h0, params)
    assert y.shape == (1, batch * seq, output_size)
    assert hn.shape == (num_layers, batch, hidden_size)
    assert jnp.allclose(y, y_ref, atol=1e-5), "fc output mismatch"
    assert jnp.allclose(hn, hn_ref, atol=1e-5), "hidden state mismatch"

    print("KERNEL_OK")
</pallas_src>

<mosaic_0001>
module attributes {stable_mosaic.version = 11 : i64} {
  func.func @rnn_fc_kernel(%arg0: memref<1x8x1xf32, #tpu.memory_space<vmem>>, %arg1: memref<1x1x16xf32, #tpu.memory_space<vmem>>, %arg2: memref<1x16xf32, #tpu.memory_space<vmem>>, %arg3: memref<16x16xf32, #tpu.memory_space<vmem>>, %arg4: memref<1x16xf32, #tpu.memory_space<vmem>>, %arg5: memref<1x16xf32, #tpu.memory_space<vmem>>, %arg6: memref<1x1xf32, #tpu.memory_space<vmem>>, %arg7: memref<1x8x1xf32, #tpu.memory_space<vmem>>, %arg8: memref<1x1x16xf32, #tpu.memory_space<vmem>>) attributes {dimension_semantics = [], scalar_prefetch = 0 : i64, scratch_operands = 0 : i64, tpu.core_type = #tpu.core_type<tc>} {
    %c0 = arith.constant 0 : index
    %c0_0 = arith.constant 0 : index
    %c0_1 = arith.constant 0 : index
    %0 = vector.load %arg0[%c0, %c0_0, %c0_1] : memref<1x8x1xf32, #tpu.memory_space<vmem>>, vector<1x8x1xf32>
    %1 = vector.shape_cast %0 : vector<1x8x1xf32> to vector<8x1xf32>
    %c0_2 = arith.constant 0 : index
    %c0_3 = arith.constant 0 : index
    %2 = vector.load %arg2[%c0_2, %c0_3] : memref<1x16xf32, #tpu.memory_space<vmem>>, vector<1x16xf32>
    %c0_4 = arith.constant 0 : index
    %c0_5 = arith.constant 0 : index
    %3 = vector.load %arg4[%c0_4, %c0_5] : memref<1x16xf32, #tpu.memory_space<vmem>>, vector<1x16xf32>
    %4 = vector.broadcast %1 : vector<8x1xf32> to vector<8x16xf32>
    %5 = vector.broadcast %2 : vector<1x16xf32> to vector<8x16xf32>
    %6 = arith.mulf %4, %5 : vector<8x16xf32>
    %7 = vector.broadcast %3 : vector<1x16xf32> to vector<8x16xf32>
    %8 = arith.addf %6, %7 : vector<8x16xf32>
    %9 = vector.shape_cast %8 : vector<8x16xf32> to vector<1x8x16xf32>
    %c0_6 = arith.constant 0 : index
    %c0_7 = arith.constant 0 : index
    %10 = vector.load %arg3[%c0_6, %c0_7] : memref<16x16xf32, #tpu.memory_space<vmem>>, vector<16x16xf32>
    %c0_8 = arith.constant 0 : index
    %c0_9 = arith.constant 0 : index
    %c0_10 = arith.constant 0 : index
    %11 = vector.load %arg1[%c0_8, %c0_9, %c0_10] : memref<1x1x16xf32, #tpu.memory_space<vmem>>, vector<1x1x16xf32>
    %12 = vector.shape_cast %11 : vector<1x1x16xf32> to vector<1x16xf32>
    %13 = vector.extract_strided_slice %9 {offsets = [0, 0, 0], sizes = [1, 1, 16], strides = [1, 1, 1]} : vector<1x8x16xf32> to vector<1x1x16xf32>
    %14 = vector.shape_cast %13 : vector<1x1x16xf32> to vector<1x16xf32>
    %cst = arith.constant dense<0.000000e+00> : vector<1x16xf32>
    %15 = tpu.matmul %12, %10, %cst {dimension_numbers = #tpu.dot_dimension_numbers<[1], [0], [0], [1], [0, 0, 1, 1], [], []>} : vector<1x16xf32>, vector<16x16xf32>, vector<1x16xf32> -> vector<1x16xf32>
    %16 = arith.addf %14, %15 : vector<1x16xf32>
    %17 = math.tanh %16 : vector<1x16xf32>
    %18 = vector.extract_strided_slice %9 {offsets = [0, 1, 0], sizes = [1, 1, 16], strides = [1, 1, 1]} : vector<1x8x16xf32> to vector<1x1x16xf32>
    %19 = vector.shape_cast %18 : vector<1x1x16xf32> to vector<1x16xf32>
    %cst_11 = arith.constant dense<0.000000e+00> : vector<1x16xf32>
    %20 = tpu.matmul %17, %10, %cst_11 {dimension_numbers = #tpu.dot_dimension_numbers<[1], [0], [0], [1], [0, 0, 1, 1], [], []>} : vector<1x16xf32>, vector<16x16xf32>, vector<1x16xf32> -> vector<1x16xf32>
    %21 = arith.addf %19, %20 : vector<1x16xf32>
    %22 = math.tanh %21 : vector<1x16xf32>
    %23 = vector.extract_strided_slice %9 {offsets = [0, 2, 0], sizes = [1, 1, 16], strides = [1, 1, 1]} : vector<1x8x16xf32> to vector<1x1x16xf32>
    %24 = vector.shape_cast %23 : vector<1x1x16xf32> to vector<1x16xf32>
    %cst_12 = arith.constant dense<0.000000e+00> : vector<1x16xf32>
    %25 = tpu.matmul %22, %10, %cst_12 {dimension_numbers = #tpu.dot_dimension_numbers<[1], [0], [0], [1], [0, 0, 1, 1], [], []>} : vector<1x16xf32>, vector<16x16xf32>, vector<1x16xf32> -> vector<1x16xf32>
    %26 = arith.addf %24, %25 : vector<1x16xf32>
    %27 = math.tanh %26 : vector<1x16xf32>
    %28 = vector.extract_strided_slice %9 {offsets = [0, 3, 0], sizes = [1, 1, 16], strides = [1, 1, 1]} : vector<1x8x16xf32> to vector<1x1x16xf32>
    %29 = vector.shape_cast %28 : vector<1x1x16xf32> to vector<1x16xf32>
    %cst_13 = arith.constant dense<0.000000e+00> : vector<1x16xf32>
    %30 = tpu.matmul %27, %10, %cst_13 {dimension_numbers = #tpu.dot_dimension_numbers<[1], [0], [0], [1], [0, 0, 1, 1], [], []>} : vector<1x16xf32>, vector<16x16xf32>, vector<1x16xf32> -> vector<1x16xf32>
    %31 = arith.addf %29, %30 : vector<1x16xf32>
    %32 = math.tanh %31 : vector<1x16xf32>
    %33 = vector.extract_strided_slice %9 {offsets = [0, 4, 0], sizes = [1, 1, 16], strides = [1, 1, 1]} : vector<1x8x16xf32> to vector<1x1x16xf32>
    %34 = vector.shape_cast %33 : vector<1x1x16xf32> to vector<1x16xf32>
    %cst_14 = arith.constant dense<0.000000e+00> : vector<1x16xf32>
    %35 = tpu.matmul %32, %10, %cst_14 {dimension_numbers = #tpu.dot_dimension_numbers<[1], [0], [0], [1], [0, 0, 1, 1], [], []>} : vector<1x16xf32>, vector<16x16xf32>, vector<1x16xf32> -> vector<1x16xf32>
    %36 = arith.addf %34, %35 : vector<1x16xf32>
    %37 = math.tanh %36 : vector<1x16xf32>
    %38 = vector.extract_strided_slice %9 {offsets = [0, 5, 0], sizes = [1, 1, 16], strides = [1, 1, 1]} : vector<1x8x16xf32> to vector<1x1x16xf32>
    %39 = vector.shape_cast %38 : vector<1x1x16xf32> to vector<1x16xf32>
    %cst_15 = arith.constant dense<0.000000e+00> : vector<1x16xf32>
    %40 = tpu.matmul %37, %10, %cst_15 {dimension_numbers = #tpu.dot_dimension_numbers<[1], [0], [0], [1], [0, 0, 1, 1], [], []>} : vector<1x16xf32>, vector<16x16xf32>, vector<1x16xf32> -> vector<1x16xf32>
    %41 = arith.addf %39, %40 : vector<1x16xf32>
    %42 = math.tanh %41 : vector<1x16xf32>
    %43 = vector.extract_strided_slice %9 {offsets = [0, 6, 0], sizes = [1, 1, 16], strides = [1, 1, 1]} : vector<1x8x16xf32> to vector<1x1x16xf32>
    %44 = vector.shape_cast %43 : vector<1x1x16xf32> to vector<1x16xf32>
    %cst_16 = arith.constant dense<0.000000e+00> : vector<1x16xf32>
    %45 = tpu.matmul %42, %10, %cst_16 {dimension_numbers = #tpu.dot_dimension_numbers<[1], [0], [0], [1], [0, 0, 1, 1], [], []>} : vector<1x16xf32>, vector<16x16xf32>, vector<1x16xf32> -> vector<1x16xf32>
    %46 = arith.addf %44, %45 : vector<1x16xf32>
    %47 = math.tanh %46 : vector<1x16xf32>
    %48 = vector.extract_strided_slice %9 {offsets = [0, 7, 0], sizes = [1, 1, 16], strides = [1, 1, 1]} : vector<1x8x16xf32> to vector<1x1x16xf32>
    %49 = vector.shape_cast %48 : vector<1x1x16xf32> to vector<1x16xf32>
    %cst_17 = arith.constant dense<0.000000e+00> : vector<1x16xf32>
    %50 = tpu.matmul %47, %10, %cst_17 {dimension_numbers = #tpu.dot_dimension_numbers<[1], [0], [0], [1], [0, 0, 1, 1], [], []>} : vector<1x16xf32>, vector<16x16xf32>, vector<1x16xf32> -> vector<1x16xf32>
    %51 = arith.addf %49, %50 : vector<1x16xf32>
    %52 = math.tanh %51 : vector<1x16xf32>
    %53 = vector.shape_cast %52 : vector<1x16xf32> to vector<1x1x16xf32>
    %c0_18 = arith.constant 0 : index
    %c0_19 = arith.constant 0 : index
    %c0_20 = arith.constant 0 : index
    %54 = vector.load %arg8[%c0_18, %c0_19, %c0_20] : memref<1x1x16xf32, #tpu.memory_space<vmem>>, vector<1x1x16xf32>
    tpu.vector_store %arg8[%c0_18, %c0_19, %c0_20], %53 {strides = array<i32>} : memref<1x1x16xf32, #tpu.memory_space<vmem>>, vector<1x1x16xf32>,
    %55 = tpu.concatenate %17, %22, %27, %32, %37, %42, %47, %52 in 0 : vector<1x16xf32>, vector<1x16xf32>, vector<1x16xf32>, vector<1x16xf32>, vector<1x16xf32>, vector<1x16xf32>, vector<1x16xf32>, vector<1x16xf32> -> vector<8x16xf32>
    %c0_21 = arith.constant 0 : index
    %c0_22 = arith.constant 0 : index
    %56 = vector.load %arg5[%c0_21, %c0_22] : memref<1x16xf32, #tpu.memory_space<vmem>>, vector<1x16xf32>
    %c0_23 = arith.constant 0 : index
    %c0_24 = arith.constant 0 : index
    %57 = vector.load %arg6[%c0_23, %c0_24] : memref<1x1xf32, #tpu.memory_space<vmem>>, vector<1x1xf32>
    %58 = vector.broadcast %56 : vector<1x16xf32> to vector<8x16xf32>
    %59 = arith.mulf %55, %58 : vector<8x16xf32>
    %cst_25 = arith.constant dense<0.000000e+00> : vector<8xf32>
    %60 = vector.multi_reduction <add>, %59, %cst_25 [1] : vector<8x16xf32> to vector<8xf32>
    %61 = vector.shape_cast %60 : vector<8xf32> to vector<8x1xf32>
    %62 = vector.broadcast %57 : vector<1x1xf32> to vector<8x1xf32>
    %63 = arith.addf %61, %62 : vector<8x1xf32>
    %64 = vector.shape_cast %63 : vector<8x1xf32> to vector<1x8x1xf32>
    %c0_26 = arith.constant 0 : index
    %c0_27 = arith.constant 0 : index
    %c0_28 = arith.constant 0 : index
    %65 = vector.load %arg7[%c0_26, %c0_27, %c0_28] : memref<1x8x1xf32, #tpu.memory_space<vmem>>, vector<1x8x1xf32>
    tpu.vector_store %arg7[%c0_26, %c0_27, %c0_28], %64 {strides = array<i32>} : memref<1x8x1xf32, #tpu.memory_space<vmem>>, vector<1x8x1xf32>,
    return
  }
}

</mosaic_0001>

<bundles_post_ra>
// kernel: tpu_custom_call.1
= control target key start
LH: loop header
LB: loop body
LE: loop exit
PB: predicated region body
PF: predicated region fallthrough
CT: control target
= control target key end

     0   :  { %s518_s0 = inlined_call_operand.vmem [shape: f32[1,8,1], index: 0, kind: input, shape index: {}]   ;;  %s519_s1 = inlined_call_operand.vmem [shape: f32[1,1,16], index: 1, kind: input, shape index: {}]   ;;  %s520_s2 = inlined_call_operand.vmem [shape: f32[1,16], index: 2, kind: input, shape index: {}]   ;;  %s521_s3 = inlined_call_operand.hbm [shape: f32[16,16], index: 3, kind: input, shape index: {}]   ;;  %s522_s4 = inlined_call_operand.vmem [shape: f32[1,16], index: 4, kind: input, shape index: {}]   ;;  %s523_s5 = inlined_call_operand.vmem [shape: f32[1,16], index: 5, kind: input, shape index: {}]   ;;  %s524_s6 = inlined_call_operand.<no memory space> [shape: f32[1,1], index: 6, kind: input, shape index: {}]   ;;  %s525_s7 = inlined_call_operand.vmem [shape: f32[1,8,1], index: 7, kind: output, shape index: {0}]   ;;  %s526_s8 = inlined_call_operand.hbm [shape: f32[1,1,16], index: 8, kind: output, shape index: {1}]  }
   0x1   :  { %v14_v0 = vstv %s524_s6 }
   0x2   :  { %15 = vst [vmem:[#allocation2] sm:$0x1] %v14_v0 }
   0x3   :  { %16 = vsyncpa [#allocation4], 0 }
   0x4   :  { %17 = vsyncpa [#allocation5], 0  ;;  %s28_s9 = sshll.u32 %s521_s3, 4  ;;  %s432_s10 = smov [#allocation3]   ;;  %s29_s9 = int_to_ptr.hbm [resolvable:$true] %s28_s9 }
   0x5   :  { %s30_s11 = sshll.u32 %s432_s10, 4  ;;  %s433_s12 = smov 128   ;;  %s31_s11 = int_to_ptr.vmem [resolvable:$true] %s30_s11 }
   0x6   :  { %s434_s13 = smov 8  }
   0x7   :  { %36 = dma.hbm_to_vmem [thread:$0]  %s29_s9, 256, %s31_s11, [#allocation4], %s433_s12, %s433_s12, %s434_s13  }
   0x8   :  { %428 = dma.done.wait [#allocation4], 256  }
   0x9   :  { %429 = vsyncadd [#allocation4], 4294967040  ;;  %v435_v1 = vmov 0   ;;  %v64_v2 = vld [vmem:[#allocation3 + $0x8] sm:$0xff]  ;;  %v63_v3 = vld [vmem:[#allocation3] sm:$0xff]  ;;  %vm66_vm0 = vcmask 130048  }
   0xa   :  { %359 = vset.pattern.permute.xlu0 %v435_v1  ;;  %v65_v4 = vld [vmem:[%s519_s1] sm:$0x1]  ;;  %84 = vmatpush.msra.mxu0 %v64_v2  ;;  %vm296_vm1 = vcmask 1040384   ;;  %vm298_vm2 = vcmask 1041408   ;;  %vm300_vm3 = vcmask 1042432   ;;  %vm302_vm4 = vcmask 1043456  }
   0xb   :  { %v47_v5 = vld [vmem:[%s518_s0] sm:$0xff]  ;;  %109 = vmatpush.msra.mxu1 %v64_v2  ;;  %138 = vmatpush.msra.mxu2 %v64_v2  ;;  %vm304_vm5 = vcmask 1044480   ;;  %vm306_vm6 = vcmask 1045504   ;;  %s334_s20 = sshll.u32 %s526_s8, 4  ;;  %vm308_vm7 = vcmask 1046528   ;;  %vm294_vm8 = vcmask 130055   ;;  %s335_s20 = int_to_ptr.hbm [resolvable:$true] %s334_s20 }
   0xc   :  { %52 = vperm.xlu0 %359, %v47_v5   ;;  %85 = vmatpush.msra.mxu0 %v63_v3  ;;  %v360_v6 = vld [vmem:[%s520_s2] ss:$0 sm:$0xff]  ;;  %s436_s2 = smov [#allocation6]   ;;  %vm323_vm9 = vcmask 7168  }
   0xd   :  { %110 = vmatpush.msra.mxu1 %v63_v3  ;;  %346 = vmatmul.msk.f32.vlgmr.msra.gmra.mxu0 %vm66_vm0, %v65_v4  ;;  %v361_v8 = vld [vmem:[%s522_s4] ss:$0 sm:$0xff]  ;;  %s332_s4 = sshll.u32 %s436_s2, 4  ;;  %s333_s4 = int_to_ptr.vmem [resolvable:$true] %s332_s4 }
   0xe   :  { %139 = vmatpush.msra.mxu2 %v63_v3  ;;  %167 = vmatpush.msra.mxu3 %v64_v2  ;;  %v362_v53 = vld [vmem:[%s523_s5] ss:$0 sm:$0xff] }
   0xf   :  { %196 = vmatpush.msrb.mxu0 %v64_v2  ;;  %225 = vmatpush.msrb.mxu1 %v64_v2  ;;  %v363_v58 = vld [vmem:[#allocation2] ss:$0 sm:$0xff] }
  0x10   :  { %254 = vmatpush.msrb.mxu2 %v64_v2  ;;  %168 = vmatpush.msra.mxu3 %v63_v3 }
  0x11   :  { %197 = vmatpush.msrb.mxu0 %v63_v3  ;;  %226 = vmatpush.msrb.mxu1 %v63_v3 }
  0x12   :  { %255 = vmatpush.msrb.mxu2 %v63_v3  ;;  %283 = vmatpush.msrb.mxu3 %v64_v2 }
  0x14   :  { %284 = vmatpush.msrb.mxu3 %v63_v3 }
  0x7e   :  { %v53_v7 = vpop.permute.xlu0 %52 }
  0x7f   :  { %v58_v9 = vmul.f32 %v360_v6, %v53_v7 }
  0x81   :  { %v62_v10 = vadd.f32 %v361_v8, %v58_v9 }
  0x8a   :  { %v87_v11 = vpop.f32.mrf.mxu0 }
  0x8b   :  { %v90_v12 = vadd.f32 %v87_v11, %v62_v10 }
  0x8d   :  { %364 = vtanh.f32 %v90_v12 }
  0x93   :  { %v365_v13 = vpop.eup %364 }
  0x94   :  { %347 = vmatmul.msk.f32.vlgmr.msra.gmra.mxu1 %vm66_vm0, %v365_v13 }
 0x111   :  { %v112_v14 = vpop.f32.mrf.mxu1 }
 0x112   :  { %v116_v15 = vrot.slane %v112_v14, 7 }
 0x114   :  { %v118_v16 = vadd.f32 %v116_v15, %v62_v10 }
 0x116   :  { %366 = vtanh.f32 %v118_v16 }
 0x11c   :  { %v367_v17 = vpop.eup %366 }
 0x11d   :  { %v121_v18 = vrot.slane %v367_v17, 1  ;;  %v297_v23 = vsel %vm296_vm1, %v365_v13, %v367_v17 }
 0x11f   :  { %348 = vmatmul.msk.f32.vlgmr.msra.gmra.mxu2 %vm66_vm0, %v121_v18 }
 0x1a2   :  { %v141_v19 = vpop.f32.mrf.mxu2 }
 0x1a3   :  { %v145_v20 = vrot.slane %v141_v19, 6 }
 0x1a5   :  { %v147_v21 = vadd.f32 %v145_v20, %v62_v10 }
 0x1a7   :  { %368 = vtanh.f32 %v147_v21 }
 0x1ad   :  { %v369_v22 = vpop.eup %368 }
 0x1ae   :  { %v150_v24 = vrot.slane %v369_v22, 2  ;;  %v299_v25 = vsel %vm298_vm2, %v297_v23, %v369_v22 }
 0x1b0   :  { %349 = vmatmul.msk.f32.vlgmr.msra.gmra.mxu3 %vm66_vm0, %v150_v24 }
 0x233   :  { %v170_v26 = vpop.f32.mrf.mxu3 }
 0x234   :  { %v174_v27 = vrot.slane %v170_v26, 5 }
 0x236   :  { %v176_v28 = vadd.f32 %v174_v27, %v62_v10 }
 0x238   :  { %370 = vtanh.f32 %v176_v28 }
 0x23e   :  { %v371_v29 = vpop.eup %370 }
 0x23f   :  { %v179_v30 = vrot.slane %v371_v29, 3  ;;  %v301_v31 = vsel %vm300_vm3, %v299_v25, %v371_v29 }
 0x241   :  { %350 = vmatmul.msk.f32.vlgmr.msrb.gmra.mxu0 %vm66_vm0, %v179_v30 }
 0x2be   :  { %v199_v32 = vpop.f32.mrf.mxu0 }
 0x2bf   :  { %v203_v33 = vrot.slane %v199_v32, 4 }
 0x2c1   :  { %v205_v34 = vadd.f32 %v203_v33, %v62_v10 }
 0x2c3   :  { %372 = vtanh.f32 %v205_v34 }
 0x2c9   :  { %v373_v35 = vpop.eup %372 }
 0x2ca   :  { %v208_v36 = vrot.slane %v373_v35, 4  ;;  %v303_v37 = vsel %vm302_vm4, %v301_v31, %v373_v35 }
 0x2cc   :  { %351 = vmatmul.msk.f32.vlgmr.msrb.gmra.mxu1 %vm66_vm0, %v208_v36 }
 0x349   :  { %v228_v38 = vpop.f32.mrf.mxu1 }
 0x34a   :  { %v232_v39 = vrot.slane %v228_v38, 3 }
 0x34c   :  { %v234_v40 = vadd.f32 %v232_v39, %v62_v10 }
 0x34e   :  { %374 = vtanh.f32 %v234_v40 }
 0x354   :  { %v375_v41 = vpop.eup %374 }
 0x355   :  { %v237_v42 = vrot.slane %v375_v41, 5  ;;  %v305_v43 = vsel %vm304_vm5, %v303_v37, %v375_v41 }
 0x357   :  { %352 = vmatmul.msk.f32.vlgmr.msrb.gmra.mxu2 %vm66_vm0, %v237_v42 }
 0x3da   :  { %v257_v44 = vpop.f32.mrf.mxu2 }
 0x3db   :  { %v261_v45 = vrot.slane %v257_v44, 2 }
 0x3dd   :  { %v263_v46 = vadd.f32 %v261_v45, %v62_v10 }
 0x3df   :  { %376 = vtanh.f32 %v263_v46 }
 0x3e5   :  { %v377_v47 = vpop.eup %376 }
 0x3e6   :  { %v266_v48 = vrot.slane %v377_v47, 6  ;;  %v307_v49 = vsel %vm306_vm6, %v305_v43, %v377_v47 }
 0x3e8   :  { %353 = vmatmul.msk.f32.vlgmr.msrb.gmra.mxu3 %vm66_vm0, %v266_v48 }
 0x46b   :  { %v286_v50 = vpop.f32.mrf.mxu3 }
 0x46c   :  { %v290_v51 = vrot.slane %v286_v50, 1 }
 0x46e   :  { %v292_v52 = vadd.f32 %v290_v51, %v62_v10 }
 0x470   :  { %378 = vtanh.f32 %v292_v52 }
 0x476   :  { %v379_v54 = vpop.eup %378 }
 0x477   :  { %v309_v55 = vsel %vm308_vm7, %v307_v49, %v379_v54  ;;  %295 = vst.msk [vmem:[#allocation6 - $0x7] sm:$0x80] %vm294_vm8, %v379_v54 }
 0x478   :  { %v315_v56 = vmul.f32 %v362_v53, %v309_v55  ;;  %337 = dma.vmem_to_hbm [thread:$0]  %s333_s4, 16, %s335_s20, [#allocation5]  }
 0x47a   :  { %v316_v57 = vsel %vm66_vm0, %v315_v56, 0.0 }
 0x47b   :  { %317 = vadd.xlane.f32.xlu0 %v316_v57 }
 0x4ee   :  { %v318_v59 = vpop.xlane.xlu0 %317 }
 0x4ef   :  { %v322_v60 = vadd.f32 %v363_v58, %v318_v59 }
 0x4f1   :  { %324 = vst.msk [vmem:[%s525_s7] sm:$0xff] %vm323_vm9, %v322_v60 }
 0x4f2   :  { %430 = dma.done.wait [#allocation5], 16  }
 0x4f3   :  { %431 = vsyncadd [#allocation5], 4294967280 }
 0x4f4   :  { %344 = vsyncpa [#allocation4], 1 }
 0x4f5   :  { %345 = vsyncpa [#allocation5], 1 }

</bundles_post_ra>
